<compile_context>
chip_gen: v7x
topology: tpu7x:2x2x1
jax: 0.10.0
libtpu: 0.0.40
codegen_flags: <defaults>
</compile_context>

<pallas_src>
import functools

import jax
import jax.numpy as jnp
from jax import lax
from jax.experimental import pallas as pl
from jax.experimental.pallas import tpu as pltpu

EPS = 1e-5  # nn.InstanceNorm2d default eps


def _round_up(x, m):
    return (x + m - 1) // m * m


def _norm_relu_write(acc, mw, o_ref, b):
    """InstanceNorm2d(affine=False) + ReLU for one image's (Cout, P) f32 slab.

    `mw` is the valid-position mask premultiplied by 1/(H*W); padded-width
    columns and the lane-padding tail contribute nothing to the statistics.
    Shifted two-pass variance avoids E[x^2]-mean^2 cancellation.
    """
    mean = jnp.sum(acc * mw, axis=1, keepdims=True)          # (Cout, 1)
    c = acc - mean                                           # needed for output anyway
    var = jnp.sum((c * c) * mw, axis=1, keepdims=True)       # (Cout, 1)
    inv_std = lax.rsqrt(var + EPS)
    o_ref[b] = jnp.maximum(c * inv_std, 0.0).astype(o_ref.dtype)


def _conv2d_block_kernel_fused(x_ref, w_ref, mw_ref, o_ref, *, B, KH, KW, Wp, P):
    """Small-Cin path: B images per step, one fused MXU matmul.

    x_ref:  (B, Cin, L)        zero-padded images, spatial dims flattened
                               row-major over the padded (Hp_ext, Wp) grid.
    w_ref:  (Cout, KH*KW*Cin)  conv weight, tap-major / Cin-minor, compute dtype.
    mw_ref: (1, P)             valid-position mask * 1/(H*W), f32.
    o_ref:  (B, Cout, P)       output, flattened over the padded-width grid.
    """
    taps = []
    for kh in range(KH):
        for kw in range(KW):
            d = kh * Wp + kw                      # static lane offset of this tap
            if B == 1:
                taps.append(x_ref[0, :, d:d + P])
            else:
                taps.append(jnp.concatenate(
                    [x_ref[b, :, d:d + P] for b in range(B)], axis=1))
    patches = jnp.concatenate(taps, axis=0)       # (KH*KW*Cin, B*P), compute dtype

    acc = jnp.dot(w_ref[...], patches,
                  preferred_element_type=jnp.float32)         # (Cout, B*P) f32

    mw = mw_ref[...]
    for b in range(B):                            # per-image InstanceNorm + ReLU
        _norm_relu_write(acc[:, b * P:(b + 1) * P], mw, o_ref, b)


def _conv2d_block_kernel_accum(x_ref, w_ref, mw_ref, o_ref, *, KH, KW, Wp, P):
    """Wide-Cin path: one image per step, 9 accumulated K=Cin matmuls.

    No (9*Cin, P) patches materialization -- each tap is a lane-offset view of
    the flattened padded image fed straight to the MXU.

    x_ref:  (1, Cin, L)            compute dtype.
    w_ref:  (KH*KW, Cout, Cin)     tap-indexed conv weight, compute dtype.
    mw_ref: (1, P)                 valid-position mask * 1/(H*W), f32.
    o_ref:  (1, Cout, P)
    """
    acc = None
    t = 0
    for kh in range(KH):
        for kw in range(KW):
            d = kh * Wp + kw
            part = jnp.dot(w_ref[t], x_ref[0, :, d:d + P],
                           preferred_element_type=jnp.float32)  # (Cout, P) f32
            acc = part if acc is None else acc + part
            t += 1
    _norm_relu_write(acc, mw_ref[...], o_ref, 0)


def conv2d_block(x_nchw, w_oihw, bias=None, *, compute_dtype=jnp.bfloat16,
                 images_per_step=None):
    """Conv2dBlock forward with default flags:
       Conv2d(3x3, stride=1, pad=1, dilation=1, bias=True)
       -> InstanceNorm2d(affine=False) -> ReLU        (featureMapSize > 4 path).

    The conv bias cancels exactly in InstanceNorm(affine=False), so it is
    accepted for API compatibility but never computed.

    x_nchw: (N, Cin, H, W) f32; w_oihw: (Cout, Cin, 3, 3); returns (N, Cout, H, W) f32.
    """
    del bias  # mathematically a no-op before InstanceNorm2d(affine=False)

    N, Cin, H, W = x_nchw.shape
    Cout, Cin_w, KH, KW = w_oihw.shape
    assert Cin_w == Cin and (KH, KW) == (3, 3)   # stride=1 / pad=1 contract
    assert H * W > 4                              # norm+ReLU path only
    pad = 1
    Wp = W + 2 * pad

    # Lane geometry: conv outputs live at flat positions p = h*Wp + w over the
    # *padded-width* grid; valid outputs where h < H and w < W.
    P = _round_up((H - 1) * Wp + W, 128)          # lane-dense output width
    d_max = (KH - 1) * Wp + (KW - 1)              # largest tap offset
    need = d_max + P                              # flattened input length needed

    # Single pad: left/right/top conv halo of 1, plus enough extra bottom rows
    # that the flattened length covers every tap of every output lane (the
    # bottom conv halo is contained in that slack).
    Hp_ext = -(-need // Wp)                       # ceil(need / Wp)
    bot = Hp_ext - H - pad                        # >= 1, i.e. includes the halo
    L = Hp_ext * Wp

    use_accum = Cin >= 64                         # avoid (9*Cin, P) patches at wide Cin
    if images_per_step is None:
        B = 1 if use_accum else min(N, 4)
    else:
        B = max(1, min(images_per_step, N))
    Np = _round_up(N, B)

    # One jnp.pad covers batch round-up, conv halo and lane-tail slack; cast to
    # compute_dtype here so both the HBM->VMEM DMA and the in-kernel tap
    # assembly move compute-dtype bytes (half, for bf16).
    x_flat = jnp.pad(
        x_nchw.astype(compute_dtype),
        ((0, Np - N), (0, 0), (pad, bot), (pad, pad)),
    ).reshape(Np, Cin, L)

    # Valid-position mask premultiplied by 1/(H*W) (built once, resident across
    # the whole grid via a constant index_map).
    p_idx = jnp.arange(P)
    mw = (((p_idx // Wp) < H) & ((p_idx % Wp) < W)).astype(jnp.float32)
    mw = (mw / float(H * W)).reshape(1, P)

    if use_accum:
        # Tap-indexed weights (KH*KW, Cout, Cin): 9 accumulated K=Cin matmuls.
        w_in = jnp.transpose(w_oihw, (2, 3, 0, 1)).reshape(KH * KW, Cout, Cin)
        w_in = w_in.astype(compute_dtype)
        w_spec = pl.BlockSpec((KH * KW, Cout, Cin), lambda n: (0, 0, 0))
        kernel = functools.partial(_conv2d_block_kernel_accum,
                                   KH=KH, KW=KW, Wp=Wp, P=P)
    else:
        # Flattened weights (Cout, KH*KW*Cin), tap-major / Cin-minor, matching
        # the in-kernel patch assembly; one fused matmul over B images.
        w_in = jnp.transpose(w_oihw, (0, 2, 3, 1)).reshape(Cout, KH * KW * Cin)
        w_in = w_in.astype(compute_dtype)
        w_spec = pl.BlockSpec((Cout, KH * KW * Cin), lambda n: (0, 0))
        kernel = functools.partial(_conv2d_block_kernel_fused,
                                   B=B, KH=KH, KW=KW, Wp=Wp, P=P)

    out_flat = pl.pallas_call(
        kernel,
        out_shape=jax.ShapeDtypeStruct((Np, Cout, P), x_nchw.dtype),
        grid_spec=pltpu.PrefetchScalarGridSpec(
            num_scalar_prefetch=0,
            grid=(Np // B,),   # image blocks; "parallel" feeds both TCs on v7x
            in_specs=[
                pl.BlockSpec((B, Cin, L), lambda n: (n, 0, 0)),
                w_spec,
                pl.BlockSpec((1, P), lambda n: (0, 0)),
            ],
            out_specs=pl.BlockSpec((B, Cout, P), lambda n: (n, 0, 0)),
        ),
        compiler_params=pltpu.CompilerParams(
            dimension_semantics=("parallel",)),
    )(x_flat, w_in, mw)

    # (Np, Cout, P) -> (N, Cout, H, W): drop batch/width/lane padding.
    # XLA fuses this slice/reshape/slice into a single strided copy.
    out = out_flat[:N, :, :H * Wp].reshape(N, Cout, H, Wp)[:, :, :, :W]
    return out


def _reference(x_nchw, w_oihw, bias):
    """Pure-JAX reference mirroring the PyTorch forward (featureMapSize > 4 path)."""
    y = lax.conv_general_dilated(
        x_nchw, w_oihw, window_strides=(1, 1), padding=((1, 1), (1, 1)),
        dimension_numbers=("NCHW", "OIHW", "NCHW"),
        precision=lax.Precision.HIGHEST)
    y = y + bias.reshape(1, -1, 1, 1)
    mean = jnp.mean(y, axis=(2, 3), keepdims=True)
    var = jnp.mean((y - mean) ** 2, axis=(2, 3), keepdims=True)
    y = (y - mean) * lax.rsqrt(var + EPS)
    return jnp.maximum(y, 0.0)


if __name__ == "__main__":
    key = jax.random.PRNGKey(0)
    kx, kw, kb, kx2, kw2, kb2 = jax.random.split(key, 6)
    KH = KW = 3

    # --- small shapes: fused-matmul path (B images per grid step) -----------
    N, Cin, Cout, H, W = 2, 4, 8, 16, 16
    x = jax.random.normal(kx, (N, Cin, H, W), dtype=jnp.float32)
    fan_in = Cin * KH * KW
    bound = 1.0 / (fan_in ** 0.5)
    w = jax.random.uniform(kw, (Cout, Cin, KH, KW), jnp.float32, -bound, bound)
    b = jax.random.uniform(kb, (Cout,), jnp.float32, -bound, bound)

    ref = _reference(x, w, b)

    out_f32 = jax.block_until_ready(
        conv2d_block(x, w, b, compute_dtype=jnp.float32))
    assert out_f32.shape == (N, Cout, H, W)
    assert jnp.allclose(out_f32, ref, atol=1e-4, rtol=1e-4), "f32 fused mismatch"

    out_bf16 = jax.block_until_ready(conv2d_block(x, w, b))   # bf16 MXU default
    assert out_bf16.shape == (N, Cout, H, W)
    assert jnp.allclose(out_bf16, ref, atol=1e-1, rtol=1e-1), "bf16 fused mismatch"

    # --- wide channels: K=Cin accumulated-matmul path (no patches buffer) ---
    N2, Cin2, Cout2, H2, W2 = 2, 128, 16, 8, 8
    x2 = jax.random.normal(kx2, (N2, Cin2, H2, W2), dtype=jnp.float32)
    fan_in2 = Cin2 * KH * KW
    bound2 = 1.0 / (fan_in2 ** 0.5)
    w2 = jax.random.uniform(kw2, (Cout2, Cin2, KH, KW), jnp.float32, -bound2, bound2)
    b2 = jax.random.uniform(kb2, (Cout2,), jnp.float32, -bound2, bound2)

    ref2 = _reference(x2, w2, b2)

    out2_f32 = jax.block_until_ready(
        conv2d_block(x2, w2, b2, compute_dtype=jnp.float32))
    assert out2_f32.shape == (N2, Cout2, H2, W2)
    assert jnp.allclose(out2_f32, ref2, atol=1e-2, rtol=1e-2), "f32 accum mismatch"

    out2_bf16 = jax.block_until_ready(conv2d_block(x2, w2, b2))
    assert jnp.allclose(out2_bf16, ref2, atol=1e-1, rtol=1e-1), "bf16 accum mismatch"

    print("KERNEL_OK")
</pallas_src>

<mosaic_0001>
module attributes {stable_mosaic.version = 11 : i64} {
  func.func @_conv2d_block_kernel_fused(%arg0: i32, %arg1: memref<2x4x432xf32, #tpu.memory_space<vmem>>, %arg2: memref<8x36xf32, #tpu.memory_space<vmem>>, %arg3: memref<1x384xf32, #tpu.memory_space<vmem>>, %arg4: memref<2x8x384xf32, #tpu.memory_space<vmem>>) attributes {dimension_semantics = [#tpu.dimension_semantics<parallel>], iteration_bounds = array<i64: 1>, scalar_prefetch = 0 : i64, scratch_operands = 0 : i64, tpu.core_type = #tpu.core_type<tc>, window_params = [{transform_indices = @transform_0, window_bounds = array<i64: 2, 4, 432>}, {pipeline_mode = #tpu.pipeline_mode<synchronous>, transform_indices = @transform_1, window_bounds = array<i64: 8, 36>}, {pipeline_mode = #tpu.pipeline_mode<synchronous>, transform_indices = @transform_2, window_bounds = array<i64: 1, 384>}, {transform_indices = @transform_3, window_bounds = array<i64: 2, 8, 384>}]} {
    %c0 = arith.constant 0 : index
    %c0_0 = arith.constant 0 : index
    %c0_1 = arith.constant 0 : index
    %0 = vector.load %arg1[%c0, %c0_0, %c0_1] : memref<2x4x432xf32, #tpu.memory_space<vmem>>, vector<1x4x384xf32>
    %1 = vector.shape_cast %0 : vector<1x4x384xf32> to vector<4x384xf32>
    %c1 = arith.constant 1 : index
    %c0_2 = arith.constant 0 : index
    %c0_3 = arith.constant 0 : index
    %2 = vector.load %arg1[%c1, %c0_2, %c0_3] : memref<2x4x432xf32, #tpu.memory_space<vmem>>, vector<1x4x384xf32>
    %3 = vector.shape_cast %2 : vector<1x4x384xf32> to vector<4x384xf32>
    %4 = tpu.concatenate %1, %3 in 1 : vector<4x384xf32>, vector<4x384xf32> -> vector<4x768xf32>
    %c0_4 = arith.constant 0 : index
    %c0_5 = arith.constant 0 : index
    %c1_6 = arith.constant 1 : index
    %5 = vector.load %arg1[%c0_4, %c0_5, %c1_6] : memref<2x4x432xf32, #tpu.memory_space<vmem>>, vector<1x4x384xf32>
    %6 = vector.shape_cast %5 : vector<1x4x384xf32> to vector<4x384xf32>
    %c1_7 = arith.constant 1 : index
    %c0_8 = arith.constant 0 : index
    %c1_9 = arith.constant 1 : index
    %7 = vector.load %arg1[%c1_7, %c0_8, %c1_9] : memref<2x4x432xf32, #tpu.memory_space<vmem>>, vector<1x4x384xf32>
    %8 = vector.shape_cast %7 : vector<1x4x384xf32> to vector<4x384xf32>
    %9 = tpu.concatenate %6, %8 in 1 : vector<4x384xf32>, vector<4x384xf32> -> vector<4x768xf32>
    %c0_10 = arith.constant 0 : index
    %c0_11 = arith.constant 0 : index
    %c2 = arith.constant 2 : index
    %10 = vector.load %arg1[%c0_10, %c0_11, %c2] : memref<2x4x432xf32, #tpu.memory_space<vmem>>, vector<1x4x384xf32>
    %11 = vector.shape_cast %10 : vector<1x4x384xf32> to vector<4x384xf32>
    %c1_12 = arith.constant 1 : index
    %c0_13 = arith.constant 0 : index
    %c2_14 = arith.constant 2 : index
    %12 = vector.load %arg1[%c1_12, %c0_13, %c2_14] : memref<2x4x432xf32, #tpu.memory_space<vmem>>, vector<1x4x384xf32>
    %13 = vector.shape_cast %12 : vector<1x4x384xf32> to vector<4x384xf32>
    %14 = tpu.concatenate %11, %13 in 1 : vector<4x384xf32>, vector<4x384xf32> -> vector<4x768xf32>
    %c0_15 = arith.constant 0 : index
    %c0_16 = arith.constant 0 : index
    %c18 = arith.constant 18 : index
    %15 = vector.load %arg1[%c0_15, %c0_16, %c18] : memref<2x4x432xf32, #tpu.memory_space<vmem>>, vector<1x4x384xf32>
    %16 = vector.shape_cast %15 : vector<1x4x384xf32> to vector<4x384xf32>
    %c1_17 = arith.constant 1 : index
    %c0_18 = arith.constant 0 : index
    %c18_19 = arith.constant 18 : index
    %17 = vector.load %arg1[%c1_17, %c0_18, %c18_19] : memref<2x4x432xf32, #tpu.memory_space<vmem>>, vector<1x4x384xf32>
    %18 = vector.shape_cast %17 : vector<1x4x384xf32> to vector<4x384xf32>
    %19 = tpu.concatenate %16, %18 in 1 : vector<4x384xf32>, vector<4x384xf32> -> vector<4x768xf32>
    %c0_20 = arith.constant 0 : index
    %c0_21 = arith.constant 0 : index
    %c19 = arith.constant 19 : index
    %20 = vector.load %arg1[%c0_20, %c0_21, %c19] : memref<2x4x432xf32, #tpu.memory_space<vmem>>, vector<1x4x384xf32>
    %21 = vector.shape_cast %20 : vector<1x4x384xf32> to vector<4x384xf32>
    %c1_22 = arith.constant 1 : index
    %c0_23 = arith.constant 0 : index
    %c19_24 = arith.constant 19 : index
    %22 = vector.load %arg1[%c1_22, %c0_23, %c19_24] : memref<2x4x432xf32, #tpu.memory_space<vmem>>, vector<1x4x384xf32>
    %23 = vector.shape_cast %22 : vector<1x4x384xf32> to vector<4x384xf32>
    %24 = tpu.concatenate %21, %23 in 1 : vector<4x384xf32>, vector<4x384xf32> -> vector<4x768xf32>
    %c0_25 = arith.constant 0 : index
    %c0_26 = arith.constant 0 : index
    %c20 = arith.constant 20 : index
    %25 = vector.load %arg1[%c0_25, %c0_26, %c20] : memref<2x4x432xf32, #tpu.memory_space<vmem>>, vector<1x4x384xf32>
    %26 = vector.shape_cast %25 : vector<1x4x384xf32> to vector<4x384xf32>
    %c1_27 = arith.constant 1 : index
    %c0_28 = arith.constant 0 : index
    %c20_29 = arith.constant 20 : index
    %27 = vector.load %arg1[%c1_27, %c0_28, %c20_29] : memref<2x4x432xf32, #tpu.memory_space<vmem>>, vector<1x4x384xf32>
    %28 = vector.shape_cast %27 : vector<1x4x384xf32> to vector<4x384xf32>
    %29 = tpu.concatenate %26, %28 in 1 : vector<4x384xf32>, vector<4x384xf32> -> vector<4x768xf32>
    %c0_30 = arith.constant 0 : index
    %c0_31 = arith.constant 0 : index
    %c36 = arith.constant 36 : index
    %30 = vector.load %arg1[%c0_30, %c0_31, %c36] : memref<2x4x432xf32, #tpu.memory_space<vmem>>, vector<1x4x384xf32>
    %31 = vector.shape_cast %30 : vector<1x4x384xf32> to vector<4x384xf32>
    %c1_32 = arith.constant 1 : index
    %c0_33 = arith.constant 0 : index
    %c36_34 = arith.constant 36 : index
    %32 = vector.load %arg1[%c1_32, %c0_33, %c36_34] : memref<2x4x432xf32, #tpu.memory_space<vmem>>, vector<1x4x384xf32>
    %33 = vector.shape_cast %32 : vector<1x4x384xf32> to vector<4x384xf32>
    %34 = tpu.concatenate %31, %33 in 1 : vector<4x384xf32>, vector<4x384xf32> -> vector<4x768xf32>
    %c0_35 = arith.constant 0 : index
    %c0_36 = arith.constant 0 : index
    %c37 = arith.constant 37 : index
    %35 = vector.load %arg1[%c0_35, %c0_36, %c37] : memref<2x4x432xf32, #tpu.memory_space<vmem>>, vector<1x4x384xf32>
    %36 = vector.shape_cast %35 : vector<1x4x384xf32> to vector<4x384xf32>
    %c1_37 = arith.constant 1 : index
    %c0_38 = arith.constant 0 : index
    %c37_39 = arith.constant 37 : index
    %37 = vector.load %arg1[%c1_37, %c0_38, %c37_39] : memref<2x4x432xf32, #tpu.memory_space<vmem>>, vector<1x4x384xf32>
    %38 = vector.shape_cast %37 : vector<1x4x384xf32> to vector<4x384xf32>
    %39 = tpu.concatenate %36, %38 in 1 : vector<4x384xf32>, vector<4x384xf32> -> vector<4x768xf32>
    %c0_40 = arith.constant 0 : index
    %c0_41 = arith.constant 0 : index
    %c38 = arith.constant 38 : index
    %40 = vector.load %arg1[%c0_40, %c0_41, %c38] : memref<2x4x432xf32, #tpu.memory_space<vmem>>, vector<1x4x384xf32>
    %41 = vector.shape_cast %40 : vector<1x4x384xf32> to vector<4x384xf32>
    %c1_42 = arith.constant 1 : index
    %c0_43 = arith.constant 0 : index
    %c38_44 = arith.constant 38 : index
    %42 = vector.load %arg1[%c1_42, %c0_43, %c38_44] : memref<2x4x432xf32, #tpu.memory_space<vmem>>, vector<1x4x384xf32>
    %43 = vector.shape_cast %42 : vector<1x4x384xf32> to vector<4x384xf32>
    %44 = tpu.concatenate %41, %43 in 1 : vector<4x384xf32>, vector<4x384xf32> -> vector<4x768xf32>
    %45 = tpu.concatenate %4, %9, %14, %19, %24, %29, %34, %39, %44 in 0 : vector<4x768xf32>, vector<4x768xf32>, vector<4x768xf32>, vector<4x768xf32>, vector<4x768xf32>, vector<4x768xf32>, vector<4x768xf32>, vector<4x768xf32>, vector<4x768xf32> -> vector<36x768xf32>
    %c0_45 = arith.constant 0 : index
    %c0_46 = arith.constant 0 : index
    %46 = vector.load %arg2[%c0_45, %c0_46] : memref<8x36xf32, #tpu.memory_space<vmem>>, vector<8x36xf32>
    %cst = arith.constant dense<0.000000e+00> : vector<8x768xf32>
    %47 = tpu.matmul %46, %45, %cst {dimension_numbers = #tpu.dot_dimension_numbers<[1], [0], [0], [1], [0, 0, 1, 1], [], []>} : vector<8x36xf32>, vector<36x768xf32>, vector<8x768xf32> -> vector<8x768xf32>
    %c0_47 = arith.constant 0 : index
    %c0_48 = arith.constant 0 : index
    %48 = vector.load %arg3[%c0_47, %c0_48] : memref<1x384xf32, #tpu.memory_space<vmem>>, vector<1x384xf32>
    %49 = vector.extract_strided_slice %47 {offsets = [0, 0], sizes = [8, 384], strides = [1, 1]} : vector<8x768xf32> to vector<8x384xf32>
    %50 = vector.broadcast %48 : vector<1x384xf32> to vector<8x384xf32>
    %51 = arith.mulf %49, %50 : vector<8x384xf32>
    %cst_49 = arith.constant dense<0.000000e+00> : vector<8xf32>
    %52 = vector.multi_reduction <add>, %51, %cst_49 [1] : vector<8x384xf32> to vector<8xf32>
    %53 = vector.shape_cast %52 : vector<8xf32> to vector<8x1xf32>
    %54 = vector.broadcast %53 : vector<8x1xf32> to vector<8x384xf32>
    %55 = arith.subf %49, %54 : vector<8x384xf32>
    %56 = arith.mulf %55, %55 : vector<8x384xf32>
    %57 = vector.broadcast %48 : vector<1x384xf32> to vector<8x384xf32>
    %58 = arith.mulf %56, %57 : vector<8x384xf32>
    %cst_50 = arith.constant dense<0.000000e+00> : vector<8xf32>
    %59 = vector.multi_reduction <add>, %58, %cst_50 [1] : vector<8x384xf32> to vector<8xf32>
    %60 = vector.shape_cast %59 : vector<8xf32> to vector<8x1xf32>
    %cst_51 = arith.constant 9.99999974E-6 : f32
    %61 = vector.broadcast %cst_51 : f32 to vector<8x1xf32>
    %62 = arith.addf %60, %61 : vector<8x1xf32>
    %63 = math.rsqrt %62 : vector<8x1xf32>
    %64 = vector.broadcast %63 : vector<8x1xf32> to vector<8x384xf32>
    %65 = arith.mulf %55, %64 : vector<8x384xf32>
    %cst_52 = arith.constant 0.000000e+00 : f32
    %66 = vector.broadcast %cst_52 : f32 to vector<8x384xf32>
    %67 = arith.maximumf %65, %66 : vector<8x384xf32>
    %c0_53 = arith.constant 0 : index
    %c0_54 = arith.constant 0 : index
    %c0_55 = arith.constant 0 : index
    %68 = vector.load %arg4[%c0_53, %c0_54, %c0_55] : memref<2x8x384xf32, #tpu.memory_space<vmem>>, vector<1x8x384xf32>
    %69 = vector.shape_cast %68 : vector<1x8x384xf32> to vector<8x384xf32>
    %70 = vector.shape_cast %67 : vector<8x384xf32> to vector<1x8x384xf32>
    tpu.vector_store %arg4[%c0_53, %c0_54, %c0_55], %70 {strides = array<i32>} : memref<2x8x384xf32, #tpu.memory_space<vmem>>, vector<1x8x384xf32>,
    %71 = vector.extract_strided_slice %47 {offsets = [0, 384], sizes = [8, 384], strides = [1, 1]} : vector<8x768xf32> to vector<8x384xf32>
    %72 = vector.broadcast %48 : vector<1x384xf32> to vector<8x384xf32>
    %73 = arith.mulf %71, %72 : vector<8x384xf32>
    %cst_56 = arith.constant dense<0.000000e+00> : vector<8xf32>
    %74 = vector.multi_reduction <add>, %73, %cst_56 [1] : vector<8x384xf32> to vector<8xf32>
    %75 = vector.shape_cast %74 : vector<8xf32> to vector<8x1xf32>
    %76 = vector.broadcast %75 : vector<8x1xf32> to vector<8x384xf32>
    %77 = arith.subf %71, %76 : vector<8x384xf32>
    %78 = arith.mulf %77, %77 : vector<8x384xf32>
    %79 = vector.broadcast %48 : vector<1x384xf32> to vector<8x384xf32>
    %80 = arith.mulf %78, %79 : vector<8x384xf32>
    %cst_57 = arith.constant dense<0.000000e+00> : vector<8xf32>
    %81 = vector.multi_reduction <add>, %80, %cst_57 [1] : vector<8x384xf32> to vector<8xf32>
    %82 = vector.shape_cast %81 : vector<8xf32> to vector<8x1xf32>
    %cst_58 = arith.constant 9.99999974E-6 : f32
    %83 = vector.broadcast %cst_58 : f32 to vector<8x1xf32>
    %84 = arith.addf %82, %83 : vector<8x1xf32>
    %85 = math.rsqrt %84 : vector<8x1xf32>
    %86 = vector.broadcast %85 : vector<8x1xf32> to vector<8x384xf32>
    %87 = arith.mulf %77, %86 : vector<8x384xf32>
    %cst_59 = arith.constant 0.000000e+00 : f32
    %88 = vector.broadcast %cst_59 : f32 to vector<8x384xf32>
    %89 = arith.maximumf %87, %88 : vector<8x384xf32>
    %c1_60 = arith.constant 1 : index
    %c0_61 = arith.constant 0 : index
    %c0_62 = arith.constant 0 : index
    %90 = vector.load %arg4[%c1_60, %c0_61, %c0_62] : memref<2x8x384xf32, #tpu.memory_space<vmem>>, vector<1x8x384xf32>
    %91 = vector.shape_cast %90 : vector<1x8x384xf32> to vector<8x384xf32>
    %92 = vector.shape_cast %89 : vector<8x384xf32> to vector<1x8x384xf32>
    tpu.vector_store %arg4[%c1_60, %c0_61, %c0_62], %92 {strides = array<i32>} : memref<2x8x384xf32, #tpu.memory_space<vmem>>, vector<1x8x384xf32>,
    return
  }
  func.func @transform_0(%arg0: i32) -> (i32, i32, i32) {
    %c0_i32 = arith.constant 0 : i32
    %c0_i32_0 = arith.constant 0 : i32
    %c0_i32_1 = arith.constant 0 : i32
    return %arg0, %c0_i32, %c0_i32_0 : i32, i32, i32
  }
  func.func @transform_1(%arg0: i32) -> (i32, i32) {
    %c0_i32 = arith.constant 0 : i32
    %c0_i32_0 = arith.constant 0 : i32
    %c0_i32_1 = arith.constant 0 : i32
    return %c0_i32, %c0_i32_0 : i32, i32
  }
  func.func @transform_2(%arg0: i32) -> (i32, i32) {
    %c0_i32 = arith.constant 0 : i32
    %c0_i32_0 = arith.constant 0 : i32
    %c0_i32_1 = arith.constant 0 : i32
    return %c0_i32, %c0_i32_0 : i32, i32
  }
  func.func @transform_3(%arg0: i32) -> (i32, i32, i32) {
    %c0_i32 = arith.constant 0 : i32
    %c0_i32_0 = arith.constant 0 : i32
    %c0_i32_1 = arith.constant 0 : i32
    return %arg0, %c0_i32, %c0_i32_0 : i32, i32, i32
  }
}

</mosaic_0001>

<bundles_post_ra>
// kernel: tpu_custom_call.1
= control target key start
LH: loop header
LB: loop body
LE: loop exit
PB: predicated region body
PF: predicated region fallthrough
CT: control target
= control target key end

     0   :  { %8 = vsyncpa [#allocation3], 0  ;;  %s1230_s0 = inlined_call_operand.hbm [shape: f32[2,4,432], index: 0, kind: input, shape index: {}]   ;;  %s1231_s1 = inlined_call_operand.hbm [shape: f32[8,36], index: 1, kind: input, shape index: {}]   ;;  %s1232_s2 = inlined_call_operand.vmem [shape: f32[1,384], index: 2, kind: input, shape index: {}]   ;;  %s1233_s3 = inlined_call_operand.hbm [shape: f32[2,8,384], index: 3, kind: output, shape index: {}]  }
   0x1   :  { %9 = vsyncpa [#allocation6], 0 }
   0x2   :  { %10 = vsyncpa [#allocation4], 0  ;;  %s930_s12 = smov [#allocation2]   ;;  %s858_s16 = scalar_lea.hbm %s1230_s0, 512 }
   0x3   :  { %s16_s13 = sshll.u32 %s930_s12, 4  ;;  %p859_p0 = scmp.ne.s32.totalorder %s1230_s0, %s858_s16  ;;  %s17_s13 = int_to_ptr.vmem [resolvable:$true] %s16_s13 }
   0x4   :  { %p862_p1 = scmp.lt.u32.totalorder %s858_s16, %s1230_s0 }
   0x6   :  { %p864_p2 = pnand %p862_p1, %p859_p0 }
   0x8   :  { %867 = shalt.err (!%p864_p2)
}
   0x9   :  { %s868_s21 = scalar_lea.vmem %s17_s13, 512  ;;  %p873_p4 = scmp.lt.s32.totalorder %s17_s13, %s17_s13 }
   0xa   :  { %p869_p3 = scmp.ne.s32.totalorder %s17_s13, %s868_s21  ;;  %p874_p5 = scmp.lt.s32.totalorder %s868_s21, %s868_s21 }
   0xc   :  { %p875_p6 = por %p874_p5, %p873_p4 }
   0xe   :  { %p876_p7 = pnand %p875_p6, %p869_p3 }
  0x10   :  { %879 = shalt.err (!%p876_p7)
}
  0x11   :  { %s931_s22 = smov 256   ;;  %s932_s23 = smov 16  }
  0x12   :  { %22 = dma.hbm_to_vmem [thread:$0]  %s1230_s0, 512, %s17_s13, [#allocation3], %s931_s22, %s931_s22, %s932_s23  }
  0x13   :  { %s933_s26 = smov [#allocation5]   ;;  %s880_s30 = scalar_lea.hbm %s1231_s1, 128 }
  0x14   :  { %s29_s27 = sshll.u32 %s933_s26, 4  ;;  %p881_p8 = scmp.ne.s32.totalorder %s1231_s1, %s880_s30  ;;  %s30_s27 = int_to_ptr.vmem [resolvable:$true] %s29_s27 }
  0x15   :  { %p884_p9 = scmp.lt.u32.totalorder %s880_s30, %s1231_s1 }
  0x17   :  { %p886_p10 = pnand %p884_p9, %p881_p8 }
  0x19   :  { %889 = shalt.err (!%p886_p10)
}
  0x1a   :  { %s890_s8 = scalar_lea.vmem %s30_s27, 128  ;;  %p895_p12 = scmp.lt.s32.totalorder %s30_s27, %s30_s27 }
  0x1b   :  { %p891_p11 = scmp.ne.s32.totalorder %s30_s27, %s890_s8  ;;  %p896_p13 = scmp.lt.s32.totalorder %s890_s8, %s890_s8 }
  0x1d   :  { %p897_p0 = por %p896_p13, %p895_p12 }
  0x1f   :  { %p898_p1 = pnand %p897_p0, %p891_p11 }
  0x21   :  { %901 = shalt.err (!%p898_p1)
}
  0x22   :  { %32 = dma.hbm_to_vmem [thread:$0]  %s1231_s1, 128, %s30_s27, [#allocation6]  }
  0x23   :  { %924 = dma.done.wait [#allocation3], 512  }
  0x24   :  { %925 = vsyncadd [#allocation3], 4294966784 }
  0x25   :  { %926 = dma.done.wait [#allocation6], 128  }
  0x26   :  { %927 = vsyncadd [#allocation6], 4294967168  ;;  %v990_v0 = vld [vmem:[#allocation2] sm:$0xff]  ;;  %v992_v1 = vld [vmem:[#allocation2 + $0x10] sm:$0xff]  ;;  %s934_s10 = smov 127   ;;  %s935_s1 = smov 110  }
  0x27   :  { %v52_v2 = vld [vmem:[#allocation2 + $0x8] sm:$0xff]  ;;  %v710_v3 = vpack.i.bf16 %v992_v1, %v990_v0  ;;  %v998_v4 = vcombine.high %v990_v0, %v990_v0  ;;  %s936_s11 = smov 126   ;;  %s937_s12 = smov 91   ;;  %v1010_v6 = vcombine.high %v992_v1, %v992_v1  ;;  %v53_v8 = vld [vmem:[#allocation2 + $0x18] sm:$0xff]  ;;  %v942_v12 = vmov 0.0  }
  0x28   :  { %s938_s13 = smov 108   ;;  %s939_s14 = smov 92   ;;  %v55_v7 = vcombine.high %v52_v2, %v52_v2  ;;  %v69_v10 = vcombine.high %v53_v8, %v53_v8  ;;  %414 = vmatprep.mubr.f32.mxu0 %v942_v12  ;;  %485 = vmatprep.mubr.f32.mxu1 %v942_v12  ;;  %vm64_vm0 = vcmask 1039360   ;;  %vm118_vm1 = vcmask 900096  }
  0x29   :  { %711 = vrot.lane.b32.xlu1 %v710_v3, %s934_s10  ;;  %v725_v5 = vpack.i.bf16 %v52_v2, %v998_v4  ;;  %s940_s15 = smov 109   ;;  %s941_s16 = smov 90   ;;  %vm89_vm2 = vcmask 1031168   ;;  %vm308_vm3 = vcmask 1043456   ;;  %vm222_vm4 = vcmask 744448  }
  0x2a   :  { %v785_v9 = vpack.i.bf16 %v55_v7, %v1010_v6  ;;  %v795_v11 = vpack.i.bf16 %v69_v10, %v53_v8  ;;  %vm170_vm5 = vcmask 883712   ;;  %vm193_vm6 = vcmask 752640  }
  0x2b   :  { %726 = vrot.lane.b32.xlu0 %v725_v5, %s934_s10  ;;  %vm141_vm7 = vcmask 891904   ;;  %vm245_vm8 = vcmask 736256   ;;  %vm334_vm9 = vcmask 293888  }
  0x2d   :  { %716 = vrot.lane.b32.xlu1 %v710_v3, %s935_s1 }
  0x2f   :  { %731 = vrot.lane.b32.xlu0 %v725_v5, %s935_s1 }
  0x31   :  { %721 = vrot.lane.b32.xlu1 %v710_v3, %s936_s11 }
  0x33   :  { %736 = vrot.lane.b32.xlu0 %v725_v5, %s936_s11 }
  0x35   :  { %746 = vrot.lane.b32.xlu1 %v725_v5, %s937_s12 }
  0x37   :  { %741 = vrot.lane.b32.xlu0 %v725_v5, %s938_s13 }
  0x39   :  { %756 = vrot.lane.b32.xlu1 %v710_v3, %s937_s12 }
  0x3b   :  { %751 = vrot.lane.b32.xlu0 %v710_v3, %s938_s13 }
  0x3d   :  { %766 = vrot.lane.b32.xlu1 %v725_v5, %s939_s14 }
  0x3f   :  { %761 = vrot.lane.b32.xlu0 %v725_v5, %s940_s15 }
  0x41   :  { %776 = vrot.lane.b32.xlu1 %v710_v3, %s939_s14 }
  0x43   :  { %771 = vrot.lane.b32.xlu0 %v710_v3, %s940_s15 }
  0x45   :  { %786 = vrot.lane.b32.xlu1 %v785_v9, %s935_s1 }
  0x47   :  { %781 = vrot.lane.b32.xlu0 %v785_v9, %s934_s10 }
  0x49   :  { %796 = vrot.lane.b32.xlu1 %v795_v11, %s935_s1 }
  0x4b   :  { %791 = vrot.lane.b32.xlu0 %v795_v11, %s934_s10 }
  0x4d   :  { %806 = vrot.lane.b32.xlu1 %v795_v11, %s936_s11 }
  0x4f   :  { %801 = vrot.lane.b32.xlu0 %v785_v9, %s936_s11 }
  0x51   :  { %816 = vrot.lane.b32.xlu1 %v785_v9, %s937_s12 }
  0x53   :  { %811 = vrot.lane.b32.xlu0 %v785_v9, %s938_s13 }
  0x55   :  { %241 = vrot.lane.b32.xlu1 %v52_v2, %s941_s16 }
  0x57   :  { %239 = vrot.lane.b32.xlu0 %v998_v4, %s941_s16 }
  0x59   :  { %826 = vrot.lane.b32.xlu1 %v795_v11, %s937_s12 }
  0x5b   :  { %821 = vrot.lane.b32.xlu0 %v795_v11, %s938_s13 }
  0x5d   :  { %831 = vrot.lane.b32.xlu1 %v785_v9, %s940_s15 }
  0x5f   :  { %237 = vrot.lane.b32.xlu0 %v990_v0, %s941_s16 }
  0x61   :  { %841 = vrot.lane.b32.xlu1 %v795_v11, %s940_s15 }
  0x63   :  { %836 = vrot.lane.b32.xlu0 %v785_v9, %s939_s14 }
  0x65   :  { %249 = vrot.lane.b32.xlu1 %v992_v1, %s941_s16 }
  0x67   :  { %846 = vrot.lane.b32.xlu0 %v795_v11, %s939_s14 }
  0x69   :  { %243 = vrot.lane.b32.xlu1 %v55_v7, %s941_s16 }
  0x6b   :  { %251 = vrot.lane.b32.xlu0 %v1010_v6, %s941_s16 }
  0x6d   :  { %255 = vrot.lane.b32.xlu1 %v69_v10, %s941_s16 }
  0x6f   :  { %253 = vrot.lane.b32.xlu0 %v53_v8, %s941_s16 }
  0x9b   :  { %v1028_v13 = vpop.permute.xlu1 %711 }
  0x9c   :  { %v713_v17 = vunpack.i.l.bf16 %v1028_v13 }
  0x9d   :  { %v1030_v14 = vpop.permute.xlu0 %726 }
  0x9e   :  { %v729_v15 = vunpack.i.h.bf16 %v1030_v14  ;;  %v728_v16 = vunpack.i.l.bf16 %v1030_v14 }
  0x9f   :  { %v1035_v18 = vpop.permute.xlu1 %716 }
  0xa0   :  { %v718_v19 = vunpack.i.l.bf16 %v1035_v18  ;;  %v66_v23 = vsel %vm64_vm0, %v728_v16, %v729_v15  ;;  %v65_v24 = vsel %vm64_vm0, %v713_v17, %v728_v16 }
  0xa1   :  { %v1038_v20 = vpop.permute.xlu0 %731  ;;  %v261_v30 = vrot.slane %v66_v23, 4  ;;  %v260_v31 = vrot.slane %v65_v24, 4 }
  0xa2   :  { %v734_v21 = vunpack.i.h.bf16 %v1038_v20  ;;  %v733_v22 = vunpack.i.l.bf16 %v1038_v20 }
  0xa3   :  { %v1046_v25 = vpop.permute.xlu1 %721  ;;  %v310_v40 = vsel %vm308_vm3, %v998_v4, %v261_v30  ;;  %v309_v45 = vsel %vm308_vm3, %v990_v0, %v260_v31 }
  0xa4   :  { %v119_v26 = vsel %vm118_vm1, %v718_v19, %v733_v22  ;;  %v723_v27 = vunpack.i.l.bf16 %v1046_v25  ;;  %v120_v28 = vsel %vm118_vm1, %v733_v22, %v734_v21 }
  0xa5   :  { %v1053_v29 = vpop.permute.xlu0 %736  ;;  %v272_v34 = vrot.slane %v119_v26, 4  ;;  %v273_v36 = vrot.slane %v120_v28, 4 }
  0xa6   :  { %v739_v32 = vunpack.i.h.bf16 %v1053_v29  ;;  %v738_v33 = vunpack.i.l.bf16 %v1053_v29 }
  0xa7   :  { %v1057_v35 = vpop.permute.xlu1 %746 }
  0xa8   :  { %v91_v37 = vsel %vm89_vm2, %v738_v33, %v739_v32  ;;  %v90_v38 = vsel %vm89_vm2, %v723_v27, %v738_v33  ;;  %v749_v43 = vunpack.i.h.bf16 %v1057_v35  ;;  %v748_v46 = vunpack.i.l.bf16 %v1057_v35 }
  0xa9   :  { %v1063_v39 = vpop.permute.xlu0 %741  ;;  %v316_v41 = vsel %vm308_vm3, %v91_v37, %v273_v36  ;;  %v315_v42 = vsel %vm308_vm3, %v90_v38, %v272_v34  ;;  %v714_v34 = vunpack.i.h.bf16 %v1028_v13 }
  0xaa   :  { %v670_v44 = vpack.c.bf16 %v316_v41, %v310_v40  ;;  %v744_v47 = vunpack.i.h.bf16 %v1063_v39  ;;  %v743_v48 = vunpack.i.l.bf16 %v1063_v39  ;;  %v672_v50 = vpack.c.bf16 %v315_v42, %v309_v45 }
  0xab   :  { %v1075_v49 = vpop.permute.xlu1 %756  ;;  %v224_v52 = vsel %vm222_vm4, %v748_v46, %v749_v43  ;;  %v719_v41 = vunpack.i.h.bf16 %v1035_v18 }
  0xac   :  { %671 = vmatprep.subr.bf16.mxu0 %v670_v44  ;;  %v172_v53 = vsel %vm170_vm5, %v743_v48, %v744_v47  ;;  %v758_v55 = vunpack.i.l.bf16 %v1075_v49  ;;  %v297_v63 = vrot.slane %v224_v52, 4 }
  0xad   :  { %v1077_v51 = vpop.permute.xlu0 %751  ;;  %673 = vmatpush1.bf16.msra.mxu0 %v672_v50  ;;  %v285_v0 = vrot.slane %v172_v53, 4 }
  0xae   :  { %v753_v56 = vunpack.i.l.bf16 %v1077_v51  ;;  %v223_v3 = vsel %vm222_vm4, %v758_v55, %v748_v46 }
  0xaf   :  { %v1085_v54 = vpop.permute.xlu1 %766  ;;  %v296_v19 = vrot.slane %v223_v3, 4 }
  0xb0   :  { %v769_v57 = vunpack.i.h.bf16 %v1085_v54  ;;  %v768_v58 = vunpack.i.l.bf16 %v1085_v54  ;;  %v171_v4 = vsel %vm170_vm5, %v753_v56, %v743_v48  ;;  %v724_v48 = vunpack.i.h.bf16 %v1046_v25 }
  0xb1   :  { %v1091_v59 = vpop.permute.xlu0 %761  ;;  %v284_v22 = vrot.slane %v171_v4, 4 }
  0xb2   :  { %v195_v60 = vsel %vm193_vm6, %v768_v58, %v769_v57  ;;  %v764_v61 = vunpack.i.h.bf16 %v1091_v59  ;;  %v763_v62 = vunpack.i.l.bf16 %v1091_v59 }
  0xb3   :  { %v1098_v2 = vpop.permute.xlu1 %776  ;;  %v328_v10 = vsel %vm308_vm3, %v195_v60, %v297_v63 }
  0xb4   :  { %v143_v5 = vsel %vm141_vm7, %v763_v62, %v764_v61  ;;  %v778_v7 = vunpack.i.l.bf16 %v1098_v2 }
  0xb5   :  { %v1106_v8 = vpop.permute.xlu0 %771  ;;  %v322_v9 = vsel %vm308_vm3, %v143_v5, %v285_v0  ;;  %v42_v0 = vld [vmem:[#allocation2 + $0x8] sm:$0xf] }
  0xb6   :  { %v194_v11 = vsel %vm193_vm6, %v778_v7, %v768_v58  ;;  %v773_v16 = vunpack.i.l.bf16 %v1106_v8  ;;  %v674_v17 = vpack.c.bf16 %v328_v10, %v322_v9 }
  0xb7   :  { %v787_v23 = vpop.permute.xlu1 %786  ;;  %v327_v28 = vsel %vm308_vm3, %v194_v11, %v296_v19 }
  0xb8   :  { %v142_v24 = vsel %vm141_vm7, %v773_v16, %v763_v62  ;;  %675 = vmatprep.subr.bf16.mxu0 %v674_v17  ;;  %v788_v36 = vunpack.i.l.bf16 %v787_v23  ;;  %v789_v38 = vunpack.i.h.bf16 %v787_v23 }
  0xb9   :  { %v782_v26 = vpop.permute.xlu0 %781  ;;  %v321_v27 = vsel %vm308_vm3, %v142_v24, %v284_v22 }
  0xba   :  { %v783_v30 = vunpack.i.l.bf16 %v782_v26  ;;  %v676_v31 = vpack.c.bf16 %v327_v28, %v321_v27  ;;  %v784_v37 = vunpack.i.h.bf16 %v782_v26  ;;  %v130_v46 = vsel %vm118_vm1, %v719_v41, %v788_v36  ;;  %v45_v28 = vld [vmem:[#allocation2 + $0x18] sm:$0xf] }
  0xbb   :  { %v797_v33 = vpop.permute.xlu1 %796  ;;  %v121_v13 = vsel %vm118_vm1, %v734_v21, %v789_v38 }
  0xbc   :  { %677 = vmatpush1.bf16.msra.mxu0 %v676_v31  ;;  %v78_v42 = vsel %vm64_vm0, %v714_v34, %v783_v30  ;;  %v67_v45 = vsel %vm64_vm0, %v729_v15, %v784_v37  ;;  %v799_v50 = vunpack.i.h.bf16 %v797_v33  ;;  %v798_v62 = vunpack.i.l.bf16 %v797_v33 }
  0xbd   :  { %v792_v40 = vpop.permute.xlu0 %791  ;;  %v263_v53 = vrot.slane %v78_v42, 4  ;;  %v262_v60 = vrot.slane %v67_v45, 4  ;;  %v275_v15 = vrot.slane %v130_v46, 4  ;;  %v274_v25 = vrot.slane %v121_v13, 4 }
  0xbe   :  { %v794_v55 = vunpack.i.h.bf16 %v792_v40  ;;  %v793_v18 = vunpack.i.l.bf16 %v792_v40  ;;  %v132_v20 = vsel %vm118_vm1, %v798_v62, %v799_v50  ;;  %v131_v29 = vsel %vm118_vm1, %v788_v36, %v798_v62 }
  0xbf   :  { %v807_v44 = vpop.permute.xlu1 %806  ;;  %v312_v10 = vsel %vm308_vm3, %v992_v1, %v263_v53  ;;  %v311_v17 = vsel %vm308_vm3, %v42_v0, %v262_v60  ;;  %v277_v23 = vrot.slane %v132_v20, 4  ;;  %v276_v33 = vrot.slane %v131_v29, 4  ;;  %v1166_v60 = vld [vmem:[#allocation5] sm:$0xff] }
  0xc0   :  { %v80_v5 = vsel %vm64_vm0, %v793_v18, %v794_v55  ;;  %v809_v7 = vunpack.i.h.bf16 %v807_v44  ;;  %v808_v9 = vunpack.i.l.bf16 %v807_v44  ;;  %v759_v45 = vunpack.i.h.bf16 %v1075_v49 }
  0xc1   :  { %v802_v52 = vpop.permute.xlu0 %801  ;;  %v265_v24 = vrot.slane %v80_v5, 4  ;;  %v754_v13 = vunpack.i.h.bf16 %v1077_v51  ;;  %v774_v50 = vunpack.i.h.bf16 %v1106_v8  ;;  %v779_v0 = vunpack.i.h.bf16 %v1098_v2 }
  0xc2   :  { %v804_v56 = vunpack.i.h.bf16 %v802_v52  ;;  %v803_v58 = vunpack.i.l.bf16 %v802_v52  ;;  %v106_v27 = vsel %vm89_vm2, %v808_v9, %v809_v7 }
  0xc3   :  { %v1126_v14 = vpop.permute.xlu1 %816  ;;  %v314_v40 = vsel %vm308_vm3, %v45_v28, %v265_v24  ;;  %v320_v41 = vsel %vm308_vm3, %v106_v27, %v277_v23 }
  0xc4   :  { %v104_v63 = vsel %vm89_vm2, %v724_v48, %v803_v58  ;;  %v92_v4 = vsel %vm89_vm2, %v739_v32, %v804_v56  ;;  %v79_v32 = vsel %vm64_vm0, %v783_v30, %v793_v18  ;;  %v105_v36 = vsel %vm89_vm2, %v803_v58, %v808_v9 }
  0xc5   :  { %v1130_v3 = vpop.permute.xlu0 %811  ;;  %v318_v21 = vsel %vm308_vm3, %v104_v63, %v275_v15  ;;  %v317_v19 = vsel %vm308_vm3, %v92_v4, %v274_v25  ;;  %v264_v34 = vrot.slane %v79_v32, 4  ;;  %v819_v37 = vunpack.i.h.bf16 %v1126_v14 }
  0xc6   :  { %v678_v16 = vpack.c.bf16 %v318_v21, %v312_v10  ;;  %v680_v22 = vpack.c.bf16 %v317_v19, %v311_v17  ;;  %v818_v30 = vunpack.i.l.bf16 %v1126_v14  ;;  %v814_v42 = vunpack.i.h.bf16 %v1130_v3 }
  0xc7   :  { %v1139_v11 = vpop.permute.xlu1 %241  ;;  %v813_v44 = vunpack.i.l.bf16 %v1130_v3  ;;  %v319_v48 = vsel %vm308_vm3, %v105_v36, %v276_v33  ;;  %v686_v52 = vpack.c.bf16 %v320_v41, %v314_v40  ;;  %v313_v53 = vsel %vm308_vm3, %v1010_v6, %v264_v34 }
  0xc8   :  { %679 = vmatprep.subr.bf16.mxu1 %v678_v16  ;;  %v225_v55 = vsel %vm222_vm4, %v749_v43, %v819_v37  ;;  %v234_v18 = vsel %vm222_vm4, %v759_v45, %v818_v30  ;;  %v173_v51 = vsel %vm170_vm5, %v744_v47, %v814_v42  ;;  %v688_v6 = vpack.c.bf16 %v319_v48, %v313_v53 }
  0xc9   :  { %v240_v26 = vpop.permute.xlu0 %239  ;;  %681 = vmatpush1.bf16.msra.mxu1 %v680_v22  ;;  %v182_v8 = vsel %vm170_vm5, %v754_v13, %v813_v44  ;;  %v298_v25 = vrot.slane %v225_v55, 4  ;;  %v299_v20 = vrot.slane %v234_v18, 4  ;;  %v286_v5 = vrot.slane %v173_v51, 4 }
  0xca   :  { %v247_v1 = vsel %vm245_vm8, %v240_v26, %v1139_v11  ;;  %v287_v2 = vrot.slane %v182_v8, 4 }
  0xcb   :  { %v827_v31 = vpop.permute.xlu1 %826  ;;  %661 = vmatprep.subr.msk.mxu0 %vm308_vm3, %v247_v1 }
  0xcc   :  { %v829_v14 = vunpack.i.h.bf16 %v827_v31  ;;  %v828_v35 = vunpack.i.l.bf16 %v827_v31 }
  0xcd   :  { %v822_v38 = vpop.permute.xlu0 %821 }
  0xce   :  { %v824_v15 = vunpack.i.h.bf16 %v822_v38  ;;  %v823_v43 = vunpack.i.l.bf16 %v822_v38  ;;  %v235_v10 = vsel %vm222_vm4, %v818_v30, %v828_v35  ;;  %v236_v16 = vsel %vm222_vm4, %v828_v35, %v829_v14 }
  0xcf   :  { %v832_v46 = vpop.permute.xlu1 %831  ;;  %v301_v33 = vrot.slane %v236_v16, 4 }
  0xd0   :  { %v834_v56 = vunpack.i.h.bf16 %v832_v46  ;;  %v833_v49 = vunpack.i.l.bf16 %v832_v46  ;;  %v183_v59 = vsel %vm170_vm5, %v813_v44, %v823_v43 }
  0xd1   :  { %v238_v58 = vpop.permute.xlu0 %237  ;;  %v288_v34 = vrot.slane %v183_v59, 4 }
  0xd2   :  { %v246_v62 = vsel %vm245_vm8, %v238_v58, %v240_v26  ;;  %v144_v39 = vsel %vm141_vm7, %v764_v61, %v834_v56  ;;  %v156_v47 = vsel %vm141_vm7, %v774_v50, %v833_v49  ;;  %v184_v61 = vsel %vm170_vm5, %v823_v43, %v824_v15  ;;  %v563_v58 = vld [vmem:[%s1232_s2] sm:$0x7]  ;;  %s943_s2 = smov [#allocation7]  }
  0xd3   :  { %v842_v63 = vpop.permute.xlu1 %841  ;;  %662 = vmatpush1.msk.msra.mxu0 %vm308_vm3, %v246_v62  ;;  %v323_v29 = vsel %vm308_vm3, %v144_v39, %v286_v5  ;;  %v289_v36 = vrot.slane %v184_v61, 4  ;;  %s648_s19 = sshll.u32 %s943_s2, 4  ;;  %s649_s19 = int_to_ptr.vmem [resolvable:$true] %s648_s19 }
  0xd4   :  { %687 = vmatprep.subr.bf16.mxu0 %v686_v52  ;;  %663 = vmatmul.mubr.msk.f32.vlgmr.msra.gmra.mrb[0].mxu0 %vm334_vm9, %v1166_v60  ;;  %v844_v3 = vunpack.i.h.bf16 %v842_v63  ;;  %v843_v21 = vunpack.i.l.bf16 %v842_v63  ;;  %s902_s20 = scalar_lea.vmem %s649_s19, 768  ;;  %p907_p3 = scmp.lt.s32.totalorder %s649_s19, %s649_s19 }
  0xd5   :  { %v837_v4 = vpop.permute.xlu0 %836  ;;  %689 = vmatpush1.bf16.msra.mxu0 %v688_v6  ;;  %556 = vmatprep.mubr.f32.mxu0 %v942_v12  ;;  %v324_v12 = vsel %vm308_vm3, %v156_v47, %v287_v2  ;;  %p903_p2 = scmp.ne.s32.totalorder %s649_s19, %s902_s20  ;;  %p908_p4 = scmp.lt.s32.totalorder %s902_s20, %s902_s20 }
  0xd6   :  { %v839_v7 = vunpack.i.h.bf16 %v837_v4  ;;  %v838_v9 = vunpack.i.l.bf16 %v837_v4  ;;  %v157_v23 = vsel %vm141_vm7, %v833_v49, %v843_v21  ;;  %v158_v32 = vsel %vm141_vm7, %v843_v21, %v844_v3 }
  0xd7   :  { %v250_v17 = vpop.permute.xlu1 %249  ;;  %v326_v41 = vsel %vm308_vm3, %v158_v32, %v289_v36  ;;  %v325_v44 = vsel %vm308_vm3, %v157_v23, %v288_v34  ;;  %p909_p5 = por %p908_p4, %p907_p3 }
  0xd8   :  { %v196_v19 = vsel %vm193_vm6, %v769_v57, %v839_v7  ;;  %v208_v22 = vsel %vm193_vm6, %v779_v0, %v838_v9  ;;  %v300_v57 = vrot.slane %v235_v10, 4 }
  0xd9   :  { %v847_v24 = vpop.permute.xlu0 %846  ;;  %v330_v26 = vsel %vm308_vm3, %v208_v22, %v299_v20  ;;  %v329_v27 = vsel %vm308_vm3, %v196_v19, %v298_v25  ;;  %p910_p6 = pnand %p909_p5, %p903_p2 }
  0xda   :  { %v849_v1 = vunpack.i.h.bf16 %v847_v24  ;;  %v848_v28 = vunpack.i.l.bf16 %v847_v24  ;;  %v682_v54 = vpack.c.bf16 %v330_v26, %v324_v12  ;;  %v684_v31 = vpack.c.bf16 %v329_v27, %v323_v29 }
  0xdb   :  { %v244_v37 = vpop.permute.xlu1 %243 }
  0xdc   :  { %v209_v30 = vsel %vm193_vm6, %v838_v9, %v848_v28  ;;  %v210_v38 = vsel %vm193_vm6, %v848_v28, %v849_v1  ;;  %683 = vmatprep.subr.bf16.mxu1 %v682_v54  ;;  %v248_v52 = vsel %vm245_vm8, %v1139_v11, %v244_v37  ;;  %v565_v11 = vlaneseq }
  0xdd   :  { %v252_v40 = vpop.permute.xlu0 %251  ;;  %685 = vmatpush1.bf16.msra.mxu1 %v684_v31  ;;  %v332_v42 = vsel %vm308_vm3, %v210_v38, %v301_v33  ;;  %v331_v45 = vsel %vm308_vm3, %v209_v30, %v300_v57 }
  0xde   :  { %v257_v46 = vsel %vm245_vm8, %v250_v17, %v252_v40  ;;  %v690_v48 = vpack.c.bf16 %v332_v42, %v326_v41  ;;  %v692_v13 = vpack.c.bf16 %v331_v45, %v325_v44  ;;  %v566_v56 = vshrl.u32 %v565_v11, 7 }
  0xdf   :  { %664 = vmatprep.subr.msk.mxu1 %vm308_vm3, %v257_v46  ;;  %v256_v50 = vpop.permute.xlu1 %255 }
  0xe0   :  { %691 = vmatprep.subr.bf16.mxu0 %v690_v48  ;;  %v567_v49 = vsub.s32 0, %v566_v56  ;;  %v571_v51 = vsub.s32 1, %v566_v56  ;;  %v575_v63 = vsub.s32 2, %v566_v56 }
  0xe1   :  { %v254_v53 = vpop.permute.xlu0 %253  ;;  %665 = vmatpush1.msk.msra.mxu1 %vm308_vm3, %v248_v52  ;;  %693 = vmatpush1.bf16.msra.mxu0 %v692_v13 }
  0xe2   :  { %v259_v55 = vsel %vm245_vm8, %v254_v53, %v256_v50  ;;  %666 = vmatmul.mubr.msk.f32.vlgmr.msra.gmra.mrb[0].mxu1 %vm334_vm9, %v1166_v60  ;;  %v258_v18 = vsel %vm245_vm8, %v252_v40, %v254_v53  ;;  %v568_v8 = vrot.slane %v563_v58, %v567_v49  ;;  %v572_v62 = vrot.slane %v563_v58, %v571_v51 }
  0xe3   :  { %667 = vmatprep.subr.msk.mxu0 %vm308_vm3, %v259_v55  ;;  %v576_v0 = vrot.slane %v563_v58, %v575_v63 }
  0xe5   :  { %668 = vmatpush1.msk.msra.mxu0 %vm308_vm3, %v258_v18 }
  0xe6   :  { %669 = vmatmul.mubr.msk.f32.vlgmr.msra.gmra.mrb[2].mxu0 %vm334_vm9, %v1166_v60 }
 0x1a7   :  { %v416_v6 = vpop.f32.mrb[0].mxu0 }
 0x1a8   :  { %v580_v14 = vmul.f32 %v568_v8, %v416_v6  ;;  %v418_v35 = vpop.f32.mrb[1].mxu0 }
 0x1a9   :  { %v581_v15 = vmul.f32 %v572_v62, %v418_v35 }
 0x1ab   :  { %v583_v43 = vadd.f32 %v581_v15, %v580_v14 }
 0x1b5   :  { %v487_v25 = vpop.f32.mrb[0].mxu1 }
 0x1b6   :  { %v582_v20 = vmul.f32 %v576_v0, %v487_v25  ;;  %v489_v60 = vpop.f32.mrb[1].mxu1 }
 0x1b7   :  { %v611_v3 = vmul.f32 %v568_v8, %v489_v60 }
 0x1b8   :  { %v584_v39 = vadd.f32 %v583_v43, %v582_v20 }
 0x1b9   :  { %v558_v47 = vpop.f32.mrb[2].mxu0 }
 0x1ba   :  { %v612_v21 = vmul.f32 %v572_v62, %v558_v47  ;;  %585 = vadd.xlane.f32.xlu0 %v584_v39  ;;  %v560_v4 = vpop.f32.mrb[3].mxu0 }
 0x1bb   :  { %v613_v5 = vmul.f32 %v576_v0, %v560_v4 }
 0x1bc   :  { %v614_v2 = vadd.f32 %v612_v21, %v611_v3 }
 0x1be   :  { %v615_v7 = vadd.f32 %v614_v2, %v613_v5 }
 0x1c0   :  { %616 = vadd.xlane.f32.xlu1 %v615_v7 }
 0x247   :  { %v586_v9 = vpop.xlane.xlu0 %585 }
 0x248   :  { %v587_v10 = vsub.f32 %v416_v6, %v586_v9  ;;  %v588_v16 = vsub.f32 %v418_v35, %v586_v9  ;;  %v589_v59 = vsub.f32 %v487_v25, %v586_v9 }
 0x24a   :  { %v590_v61 = vmul.f32 %v587_v10, %v587_v10  ;;  %v591_v17 = vmul.f32 %v588_v16, %v588_v16  ;;  %v592_v19 = vmul.f32 %v589_v59, %v589_v59 }
 0x24c   :  { %v593_v22 = vmul.f32 %v590_v61, %v568_v8  ;;  %v594_v12 = vmul.f32 %v591_v17, %v572_v62  ;;  %v595_v23 = vmul.f32 %v592_v19, %v576_v0 }
 0x24d   :  { %v617_v29 = vpop.xlane.xlu1 %616 }
 0x24e   :  { %v618_v32 = vsub.f32 %v489_v60, %v617_v29  ;;  %v619_v24 = vsub.f32 %v558_v47, %v617_v29  ;;  %v620_v26 = vsub.f32 %v560_v4, %v617_v29  ;;  %v596_v27 = vadd.f32 %v594_v12, %v593_v22 }
 0x250   :  { %v621_v1 = vmul.f32 %v618_v32, %v618_v32  ;;  %v622_v28 = vmul.f32 %v619_v24, %v619_v24  ;;  %v623_v54 = vmul.f32 %v620_v26, %v620_v26  ;;  %v597_v31 = vadd.f32 %v596_v27, %v595_v23 }
 0x252   :  { %598 = vadd.xlane.f32.xlu0 %v597_v31  ;;  %v624_v57 = vmul.f32 %v621_v1, %v568_v8  ;;  %v625_v33 = vmul.f32 %v622_v28, %v572_v62  ;;  %v626_v34 = vmul.f32 %v623_v54, %v576_v0 }
 0x254   :  { %v627_v36 = vadd.f32 %v625_v33, %v624_v57 }
 0x256   :  { %v628_v37 = vadd.f32 %v627_v36, %v626_v34 }
 0x258   :  { %629 = vadd.xlane.f32.xlu0 %v628_v37 }
 0x2df   :  { %v599_v30 = vpop.xlane.xlu0 %598 }
 0x2e0   :  { %v600_v38 = vadd.f32 1e-05, %v599_v30 }
 0x2e2   :  { %854 = vrsqrt.f32 %v600_v38 }
 0x2e5   :  { %v630_v40 = vpop.xlane.xlu0 %629 }
 0x2e6   :  { %v631_v41 = vadd.f32 1e-05, %v630_v40 }
 0x2e8   :  { %856 = vrsqrt.f32 %v631_v41 }
 0x2ec   :  { %v855_v42 = vpop.eup %854 }
 0x2ed   :  { %v602_v44 = vmul.f32 %v855_v42, %v587_v10  ;;  %v603_v45 = vmul.f32 %v855_v42, %v588_v16  ;;  %v604_v46 = vmul.f32 %v855_v42, %v589_v59 }
 0x2ef   :  { %v605_v48 = vmax.f32 %v602_v44, 0.0  ;;  %v606_v13 = vmax.f32 %v603_v45, 0.0  ;;  %v607_v50 = vmax.f32 %v604_v46, 0.0 }
 0x2f1   :  { %608 = vst [vmem:[#allocation7] sm:$0xff] %v605_v48  ;;  %609 = vst [vmem:[#allocation7 + $0x8] sm:$0xff] %v606_v13 }
 0x2f2   :  { %610 = vst [vmem:[#allocation7 + $0x10] sm:$0xff] %v607_v50  ;;  %v857_v52 = vpop.eup %856 }
 0x2f3   :  { %v633_v53 = vmul.f32 %v857_v52, %v618_v32  ;;  %v634_v55 = vmul.f32 %v857_v52, %v619_v24  ;;  %v635_v18 = vmul.f32 %v857_v52, %v620_v26 }
 0x2f5   :  { %v636_v11 = vmax.f32 %v633_v53, 0.0  ;;  %v637_v56 = vmax.f32 %v634_v55, 0.0  ;;  %v638_v49 = vmax.f32 %v635_v18, 0.0 }
 0x2f7   :  { %640 = vst [vmem:[#allocation7 + $0x18] sm:$0xff] %v636_v11  ;;  %641 = vst [vmem:[#allocation7 + $0x20] sm:$0xff] %v637_v56 }
 0x2f8   :  { %642 = vst [vmem:[#allocation7 + $0x28] sm:$0xff] %v638_v49 }
 0x2f9   :  { %913 = shalt.err (!%p910_p6)
}
 0x2fa   :  { %s914_s23 = scalar_lea.hbm %s1233_s3, 768 }
 0x2fb   :  { %p915_p7 = scmp.ne.s32.totalorder %s1233_s3, %s914_s23  ;;  %p918_p8 = scmp.lt.u32.totalorder %s914_s23, %s1233_s3 }
 0x2fd   :  { %p920_p9 = pnand %p918_p8, %p915_p7 }
 0x2ff   :  { %923 = shalt.err (!%p920_p9)
}
 0x300   :  { %s944_s28 = smov 384   ;;  %s945_s29 = smov 24  }
 0x301   :  { %654 = dma.vmem_to_hbm [thread:$0]  %s649_s19, 768, %s1233_s3, [#allocation4], %s944_s28, %s944_s28, %s945_s29  }
 0x302   :  { %928 = dma.done.wait [#allocation4], 768  }
 0x303   :  { %929 = vsyncadd [#allocation4], 4294966528 }
 0x304   :  { %658 = vsyncpa [#allocation3], 1 }
 0x305   :  { %659 = vsyncpa [#allocation6], 1 }
 0x306   :  { %660 = vsyncpa [#allocation4], 1 }

</bundles_post_ra>
